<compile_context>
chip_gen: v6e
topology: v6e:2x2x1
jax: 0.10.0
libtpu: 0.0.40
codegen_flags: <defaults>
</compile_context>

<pallas_src>
import jax
import jax.numpy as jnp
import numpy as np
from jax import lax
from jax.experimental import pallas as pl
from jax.experimental.pallas import tpu as pltpu

NUM_GROUPS = 8
EPS = 1e-5


def tconv_gn_relu_kernel(p_ref, w_ref, b_ref, gamma_ref, beta_ref, gg_ref, o_ref):
    """Fused polyphase ConvTranspose2d + GroupNorm(8) + ReLU, one batch element.

    p_ref:     (4*C_in, H*W)      bf16  im2col patches (4 one-pixel shifts stacked)
    w_ref:     (4*C_out, 4*C_in)  bf16  fused polyphase weight (unused taps are zero)
    b_ref:     (4*C_out, 1)       f32   conv bias, tiled over the 4 output phases
    gamma_ref: (4*C_out, 1)       f32   GroupNorm scale, tiled over phases
    beta_ref:  (4*C_out, 1)       f32   GroupNorm shift, tiled over phases
    gg_ref:    (4*C_out, 4*C_out) f32   same-group indicator (row r, r' in same group)
    o_ref:     (4*C_out, H*W)     f32   phase-separated output, H*W lane-dense
    """
    rows, hw = o_ref.shape
    inv_n = 1.0 / float(rows * hw // NUM_GROUPS)   # = 1 / (H_out*W_out * C_out/G)

    # ---- transposed conv: one MXU matmul, M=4*C_out, K=4*C_in, N=H*W ----
    acc = jnp.dot(w_ref[...], p_ref[...], preferred_element_type=jnp.float32)
    acc = acc + b_ref[...]                                         # (rows, hw)

    # ---- GroupNorm(8): two-pass (mean, then centered sum of squares) ----
    row_sum = jnp.sum(acc, axis=1, keepdims=True)                  # (rows, 1)
    mean = jnp.dot(gg_ref[...], row_sum,
                   preferred_element_type=jnp.float32) * inv_n     # per-row group mean
    d = acc - mean
    row_ss = jnp.sum(d * d, axis=1, keepdims=True)                 # (rows, 1)
    var = jnp.dot(gg_ref[...], row_ss,
                  preferred_element_type=jnp.float32) * inv_n      # per-row group var
    y = d * lax.rsqrt(var + EPS) * gamma_ref[...] + beta_ref[...]
    o_ref[...] = jnp.maximum(y, 0.0).astype(o_ref.dtype)           # ReLU


def transpose_conv_block(x, w_t, bias, gamma, beta):
    """ConvTranspose2d(c_in,c_out,3,stride=2,pad=1,out_pad=1) -> GroupNorm(8) -> ReLU.

    x: (N, C_in, H, W) NCHW float32. w_t: (C_in, C_out, 3, 3) (PyTorch layout).
    Returns (N, C_out, 2H, 2W) NCHW float32.
    """
    n, c_in, h, w = x.shape
    c_out = w_t.shape[1]
    assert c_out % NUM_GROUPS == 0
    hw = h * w
    shifts = ((0, 0), (0, 1), (1, 0), (1, 1))

    # ---- im2col patches in bf16: 4 one-pixel shifts of x, zero past the edge ----
    xp = jnp.pad(x.astype(jnp.bfloat16), ((0, 0), (0, 0), (0, 1), (0, 1)))
    patches = jnp.concatenate(
        [xp[:, :, di:di + h, dj:dj + w] for (di, dj) in shifts], axis=1)
    patches = patches.reshape(n, 4 * c_in, hw)                     # (N, 4*C_in, H*W)

    # ---- fused polyphase weight ----
    # Output pixel (2i+ph, 2j+pw) = sum over shifts (di,dj) of
    #     w_t[:, :, kh, kw].T @ x[:, i+di, j+dj]   with (kh, kw) given by `tap`
    # (stride-2 sub-pixel decomposition of ConvTranspose2d(k=3, pad=1, out_pad=1)).
    tap = {(0, 0): 1, (1, 0): 2, (1, 1): 0}   # (phase_parity, shift) -> original kernel idx
    wf = w_t.astype(jnp.float32)
    zero_blk = jnp.zeros((c_out, c_in), jnp.float32)
    blocks = []
    for ph in range(2):
        for pw in range(2):
            row = []
            for (di, dj) in shifts:
                if (ph, di) in tap and (pw, dj) in tap:
                    row.append(wf[:, :, tap[(ph, di)], tap[(pw, dj)]].T)   # (C_out, C_in)
                else:
                    row.append(zero_blk)
            blocks.append(jnp.concatenate(row, axis=1))            # (C_out, 4*C_in)
    w_all = jnp.concatenate(blocks, axis=0).astype(jnp.bfloat16)   # (4*C_out, 4*C_in)

    # ---- per-row affine params and same-group indicator for GroupNorm ----
    cpg = c_out // NUM_GROUPS
    bias_row = jnp.tile(bias.astype(jnp.float32), 4).reshape(4 * c_out, 1)
    gamma_row = jnp.tile(gamma.astype(jnp.float32), 4).reshape(4 * c_out, 1)
    beta_row = jnp.tile(beta.astype(jnp.float32), 4).reshape(4 * c_out, 1)
    gid = (jnp.arange(4 * c_out) % c_out) // cpg
    gg = (gid[:, None] == gid[None, :]).astype(jnp.float32)        # (4*C_out, 4*C_out)

    out = pl.pallas_call(
        tconv_gn_relu_kernel,
        out_shape=jax.ShapeDtypeStruct((n, 4 * c_out, hw), jnp.float32),
        grid=(n,),
        in_specs=[
            pl.BlockSpec((None, 4 * c_in, hw), lambda i: (i, 0, 0)),
            pl.BlockSpec((4 * c_out, 4 * c_in), lambda i: (0, 0)),
            pl.BlockSpec((4 * c_out, 1), lambda i: (0, 0)),
            pl.BlockSpec((4 * c_out, 1), lambda i: (0, 0)),
            pl.BlockSpec((4 * c_out, 1), lambda i: (0, 0)),
            pl.BlockSpec((4 * c_out, 4 * c_out), lambda i: (0, 0)),
        ],
        out_specs=pl.BlockSpec((None, 4 * c_out, hw), lambda i: (i, 0, 0)),
        compiler_params=pltpu.CompilerParams(
            dimension_semantics=("parallel",)),
    )(patches, w_all, bias_row, gamma_row, beta_row, gg)

    # ---- depth-to-space (pixel shuffle): (n, ph, pw, c, i, j) -> NCHW ----
    out = out.reshape(n, 2, 2, c_out, h, w)
    out = jnp.transpose(out, (0, 3, 4, 1, 5, 2))                   # (n, c, i, ph, j, pw)
    return out.reshape(n, c_out, 2 * h, 2 * w)


def _reference(x, w_t, bias, gamma, beta, *, k=3, pad=1, out_pad=1, stride=2):
    """Pure-JAX reference (XLA conv).  x/w are quantized to bf16 to match the
    kernel's MXU input precision (both sides accumulate in f32)."""
    n, c_in, h, w = x.shape
    c_out = w_t.shape[1]
    lead = k - 1 - pad
    trail = k - 1 - pad + out_pad
    xq = x.astype(jnp.bfloat16).astype(jnp.float32)
    wq = w_t.astype(jnp.bfloat16).astype(jnp.float32)
    w_oihw = jnp.transpose(wq[:, :, ::-1, ::-1], (1, 0, 2, 3))
    conv = lax.conv_general_dilated(
        xq, w_oihw,
        window_strides=(1, 1),
        padding=[(lead, trail), (lead, trail)],
        lhs_dilation=(stride, stride),
        dimension_numbers=('NCHW', 'OIHW', 'NCHW'),
        precision=lax.Precision.HIGHEST)
    conv = conv + bias.reshape(1, c_out, 1, 1)
    h_out, w_out = conv.shape[2], conv.shape[3]
    rg = conv.reshape(n, NUM_GROUPS, c_out // NUM_GROUPS, h_out, w_out)
    mean = rg.mean(axis=(2, 3, 4), keepdims=True)
    var = rg.var(axis=(2, 3, 4), keepdims=True)
    rn = ((rg - mean) / jnp.sqrt(var + EPS)).reshape(n, c_out, h_out, w_out)
    y = rn * gamma.reshape(1, c_out, 1, 1) + beta.reshape(1, c_out, 1, 1)
    return jnp.maximum(y, 0.0)


if __name__ == "__main__":
    key = jax.random.PRNGKey(0)
    N, C_IN, C_OUT, H, W, K = 2, 4, 16, 16, 16, 3
    k1, k2, k3, k4, k5 = jax.random.split(key, 5)

    x = jax.random.normal(k1, (N, C_IN, H, W), jnp.float32)
    # ConvTranspose2d weight shape (C_in, C_out, k, k); kaiming_normal_-like std.
    std = (2.0 / (C_OUT * K * K)) ** 0.5
    w_t = jax.random.normal(k2, (C_IN, C_OUT, K, K), jnp.float32) * std
    bias = jax.random.normal(k3, (C_OUT,), jnp.float32) * 0.05
    gamma = 1.0 + 0.1 * jax.random.normal(k4, (C_OUT,), jnp.float32)
    beta = 0.1 * jax.random.normal(k5, (C_OUT,), jnp.float32)

    out = jax.block_until_ready(transpose_conv_block(x, w_t, bias, gamma, beta))
    assert out.shape == (N, C_OUT, 2 * H, 2 * W), out.shape

    ref = _reference(x, w_t, bias, gamma, beta)
    np.testing.assert_allclose(np.asarray(out), np.asarray(ref),
                               atol=2e-3, rtol=2e-3)
    print("KERNEL_OK")
</pallas_src>

<mosaic_0001>
module attributes {stable_mosaic.version = 11 : i64} {
  func.func @tconv_gn_relu_kernel(%arg0: i32, %arg1: memref<1x16x256xbf16, #tpu.memory_space<vmem>>, %arg2: memref<64x16xbf16, #tpu.memory_space<vmem>>, %arg3: memref<64x1xf32, #tpu.memory_space<vmem>>, %arg4: memref<64x1xf32, #tpu.memory_space<vmem>>, %arg5: memref<64x1xf32, #tpu.memory_space<vmem>>, %arg6: memref<64x64xf32, #tpu.memory_space<vmem>>, %arg7: memref<1x64x256xf32, #tpu.memory_space<vmem>>) attributes {dimension_semantics = [#tpu.dimension_semantics<parallel>], iteration_bounds = array<i64: 2>, scalar_prefetch = 0 : i64, scratch_operands = 0 : i64, tpu.core_type = #tpu.core_type<tc>, window_params = [{transform_indices = @transform_0, window_bounds = array<i64: 1, 16, 256>}, {pipeline_mode = #tpu.pipeline_mode<synchronous>, transform_indices = @transform_1, window_bounds = array<i64: 64, 16>}, {pipeline_mode = #tpu.pipeline_mode<synchronous>, transform_indices = @transform_2, window_bounds = array<i64: 64, 1>}, {pipeline_mode = #tpu.pipeline_mode<synchronous>, transform_indices = @transform_3, window_bounds = array<i64: 64, 1>}, {pipeline_mode = #tpu.pipeline_mode<synchronous>, transform_indices = @transform_4, window_bounds = array<i64: 64, 1>}, {pipeline_mode = #tpu.pipeline_mode<synchronous>, transform_indices = @transform_5, window_bounds = array<i64: 64, 64>}, {transform_indices = @transform_6, window_bounds = array<i64: 1, 64, 256>}]} {
    %c0 = arith.constant 0 : index
    %c0_0 = arith.constant 0 : index
    %0 = vector.load %arg2[%c0, %c0_0] : memref<64x16xbf16, #tpu.memory_space<vmem>>, vector<64x16xbf16>
    %c0_1 = arith.constant 0 : index
    %c0_2 = arith.constant 0 : index
    %c0_3 = arith.constant 0 : index
    %1 = vector.load %arg1[%c0_1, %c0_2, %c0_3] : memref<1x16x256xbf16, #tpu.memory_space<vmem>>, vector<1x16x256xbf16>
    %2 = vector.shape_cast %1 : vector<1x16x256xbf16> to vector<16x256xbf16>
    %cst = arith.constant dense<0.000000e+00> : vector<64x256xf32>
    %3 = tpu.matmul %0, %2, %cst {dimension_numbers = #tpu.dot_dimension_numbers<[1], [0], [0], [1], [0, 0, 1, 1], [], []>} : vector<64x16xbf16>, vector<16x256xbf16>, vector<64x256xf32> -> vector<64x256xf32>
    %c0_4 = arith.constant 0 : index
    %c0_5 = arith.constant 0 : index
    %4 = vector.load %arg3[%c0_4, %c0_5] : memref<64x1xf32, #tpu.memory_space<vmem>>, vector<64x1xf32>
    %5 = vector.broadcast %4 : vector<64x1xf32> to vector<64x256xf32>
    %6 = arith.addf %3, %5 : vector<64x256xf32>
    %cst_6 = arith.constant dense<0.000000e+00> : vector<64xf32>
    %7 = vector.multi_reduction <add>, %6, %cst_6 [1] : vector<64x256xf32> to vector<64xf32>
    %8 = vector.shape_cast %7 : vector<64xf32> to vector<64x1xf32>
    %c0_7 = arith.constant 0 : index
    %c0_8 = arith.constant 0 : index
    %9 = vector.load %arg6[%c0_7, %c0_8] : memref<64x64xf32, #tpu.memory_space<vmem>>, vector<64x64xf32>
    %cst_9 = arith.constant dense<0.000000e+00> : vector<64x1xf32>
    %10 = tpu.matmul %9, %8, %cst_9 {dimension_numbers = #tpu.dot_dimension_numbers<[1], [0], [0], [1], [0, 0, 1, 1], [], []>} : vector<64x64xf32>, vector<64x1xf32>, vector<64x1xf32> -> vector<64x1xf32>
    %cst_10 = arith.constant 4.8828125E-4 : f32
    %11 = vector.broadcast %cst_10 : f32 to vector<64x1xf32>
    %12 = arith.mulf %10, %11 : vector<64x1xf32>
    %13 = vector.broadcast %12 : vector<64x1xf32> to vector<64x256xf32>
    %14 = arith.subf %6, %13 : vector<64x256xf32>
    %15 = arith.mulf %14, %14 : vector<64x256xf32>
    %cst_11 = arith.constant dense<0.000000e+00> : vector<64xf32>
    %16 = vector.multi_reduction <add>, %15, %cst_11 [1] : vector<64x256xf32> to vector<64xf32>
    %17 = vector.shape_cast %16 : vector<64xf32> to vector<64x1xf32>
    %c0_12 = arith.constant 0 : index
    %c0_13 = arith.constant 0 : index
    %18 = vector.load %arg6[%c0_12, %c0_13] : memref<64x64xf32, #tpu.memory_space<vmem>>, vector<64x64xf32>
    %cst_14 = arith.constant dense<0.000000e+00> : vector<64x1xf32>
    %19 = tpu.matmul %18, %17, %cst_14 {dimension_numbers = #tpu.dot_dimension_numbers<[1], [0], [0], [1], [0, 0, 1, 1], [], []>} : vector<64x64xf32>, vector<64x1xf32>, vector<64x1xf32> -> vector<64x1xf32>
    %cst_15 = arith.constant 4.8828125E-4 : f32
    %20 = vector.broadcast %cst_15 : f32 to vector<64x1xf32>
    %21 = arith.mulf %19, %20 : vector<64x1xf32>
    %cst_16 = arith.constant 9.99999974E-6 : f32
    %22 = vector.broadcast %cst_16 : f32 to vector<64x1xf32>
    %23 = arith.addf %21, %22 : vector<64x1xf32>
    %24 = math.rsqrt %23 : vector<64x1xf32>
    %25 = vector.broadcast %24 : vector<64x1xf32> to vector<64x256xf32>
    %26 = arith.mulf %14, %25 : vector<64x256xf32>
    %c0_17 = arith.constant 0 : index
    %c0_18 = arith.constant 0 : index
    %27 = vector.load %arg4[%c0_17, %c0_18] : memref<64x1xf32, #tpu.memory_space<vmem>>, vector<64x1xf32>
    %28 = vector.broadcast %27 : vector<64x1xf32> to vector<64x256xf32>
    %29 = arith.mulf %26, %28 : vector<64x256xf32>
    %c0_19 = arith.constant 0 : index
    %c0_20 = arith.constant 0 : index
    %30 = vector.load %arg5[%c0_19, %c0_20] : memref<64x1xf32, #tpu.memory_space<vmem>>, vector<64x1xf32>
    %31 = vector.broadcast %30 : vector<64x1xf32> to vector<64x256xf32>
    %32 = arith.addf %29, %31 : vector<64x256xf32>
    %cst_21 = arith.constant 0.000000e+00 : f32
    %33 = vector.broadcast %cst_21 : f32 to vector<64x256xf32>
    %34 = arith.maximumf %32, %33 : vector<64x256xf32>
    %c0_22 = arith.constant 0 : index
    %c0_23 = arith.constant 0 : index
    %c0_24 = arith.constant 0 : index
    %35 = vector.load %arg7[%c0_22, %c0_23, %c0_24] : memref<1x64x256xf32, #tpu.memory_space<vmem>>, vector<1x64x256xf32>
    %36 = vector.shape_cast %35 : vector<1x64x256xf32> to vector<64x256xf32>
    %37 = vector.shape_cast %34 : vector<64x256xf32> to vector<1x64x256xf32>
    tpu.vector_store %arg7[%c0_22, %c0_23, %c0_24], %37 {strides = array<i32>} : memref<1x64x256xf32, #tpu.memory_space<vmem>>, vector<1x64x256xf32>,
    return
  }
  func.func @transform_0(%arg0: i32) -> (i32, i32, i32) {
    %c0_i32 = arith.constant 0 : i32
    %c0_i32_0 = arith.constant 0 : i32
    %c0_i32_1 = arith.constant 0 : i32
    return %arg0, %c0_i32, %c0_i32_0 : i32, i32, i32
  }
  func.func @transform_1(%arg0: i32) -> (i32, i32) {
    %c0_i32 = arith.constant 0 : i32
    %c0_i32_0 = arith.constant 0 : i32
    %c0_i32_1 = arith.constant 0 : i32
    return %c0_i32, %c0_i32_0 : i32, i32
  }
  func.func @transform_2(%arg0: i32) -> (i32, i32) {
    %c0_i32 = arith.constant 0 : i32
    %c0_i32_0 = arith.constant 0 : i32
    %c0_i32_1 = arith.constant 0 : i32
    return %c0_i32, %c0_i32_0 : i32, i32
  }
  func.func @transform_3(%arg0: i32) -> (i32, i32) {
    %c0_i32 = arith.constant 0 : i32
    %c0_i32_0 = arith.constant 0 : i32
    %c0_i32_1 = arith.constant 0 : i32
    return %c0_i32, %c0_i32_0 : i32, i32
  }
  func.func @transform_4(%arg0: i32) -> (i32, i32) {
    %c0_i32 = arith.constant 0 : i32
    %c0_i32_0 = arith.constant 0 : i32
    %c0_i32_1 = arith.constant 0 : i32
    return %c0_i32, %c0_i32_0 : i32, i32
  }
  func.func @transform_5(%arg0: i32) -> (i32, i32) {
    %c0_i32 = arith.constant 0 : i32
    %c0_i32_0 = arith.constant 0 : i32
    %c0_i32_1 = arith.constant 0 : i32
    return %c0_i32, %c0_i32_0 : i32, i32
  }
  func.func @transform_6(%arg0: i32) -> (i32, i32, i32) {
    %c0_i32 = arith.constant 0 : i32
    %c0_i32_0 = arith.constant 0 : i32
    %c0_i32_1 = arith.constant 0 : i32
    return %arg0, %c0_i32, %c0_i32_0 : i32, i32, i32
  }
}

</mosaic_0001>

<bundles_post_ra>
// kernel: tpu_custom_call.1
= control target key start
LH: loop header
LB: loop body
LE: loop exit
PB: predicated region body
PF: predicated region fallthrough
CT: control target
= control target key end

     0   :  { %11 = vsyncpa [#allocation3], 0  ;;  %s1857_s0 = inlined_call_operand.vmem [shape: bf16[2,16,256], index: 0, kind: input, shape index: {}]   ;;  %s1858_s1 = inlined_call_operand.vmem [shape: bf16[64,16], index: 1, kind: input, shape index: {}]   ;;  %s1859_s2 = inlined_call_operand.vmem [shape: f32[64,1], index: 2, kind: input, shape index: {}]   ;;  %s1860_s3 = inlined_call_operand.vmem [shape: f32[64,1], index: 3, kind: input, shape index: {}]   ;;  %s1861_s4 = inlined_call_operand.vmem [shape: f32[64,1], index: 4, kind: input, shape index: {}]   ;;  %s1862_s5 = inlined_call_operand.vmem [shape: f32[64,64], index: 5, kind: input, shape index: {}]   ;;  %s1863_s6 = inlined_call_operand.hbm [shape: f32[2,64,256], index: 6, kind: output, shape index: {}]  }
   0x1   :  { %13 = vsyncpa [#allocation3 + $0x1], 0  ;;  %s1424_s21 = smov 0   ;;  %s1426_s22 = smov 0  }
   0x2   :  { %s1428_s23 = smov 0   ;;  %s1430_s24 = smov 0  }
   0x3 LB: > { %s1445_s25 = sadd.s32 4294967295, %s1383_s24   ;;  %s1112_s26 = sadd.s32 4294967294, %s1383_s24   ;;  %s1383_s24 = sphi %s1430_s24, %s1869_s24   ;;  %s1379_s23 = sphi %s1428_s23, %s1868_s23   ;;  %s1375_s22 = sphi %s1426_s22, %s1867_s22   ;;  %s1371_s21 = sphi %s1424_s21, %s1866_s21  }
   0x4   : > { %s1449_s27 = sadd.s32 1, %s1383_s24   ;;  %s157_s28 = sadd.s32 1, %s1379_s23 }
   0x5   : > { %s154_s29 = ssub.s32 %s1383_s24, %s1449_s27  ;;  %p167_p0 = scmp.ne.s32.totalorder %s1379_s23, %s1375_s22 }
   0x6   : > { %p155_p1 = scmp.eq.s32.totalorder %s154_s29, 0  ;;  %p168_p2 = scmp.eq.s32.totalorder %s1445_s25, 1 }
   0x7   : > { %p173_p3 = scmp.ne.s32.totalorder %s1375_s22, %s1371_s21  ;;  %p174_p4 = scmp.eq.s32.totalorder %s1112_s26, 1 }
   0x8   : > { %s1460_s30 = scalar_select %p155_p1, %s1379_s23, %s157_s28  }
   0x9   : > { %p1462_p5 = por %p168_p2, %p167_p0  ;;  %p1466_p6 = por %p174_p4, %p173_p3 }
   0xa   : > { %p1115_p7 = scmp.ge.s32.totalorder %s1383_s24, 1  ;;  %p215_p8 = scmp.lt.s32.totalorder %s1383_s24, 3 }
   0xc   : > { %p216_p9 = pnand %p1115_p7, %p215_p8 }
   0xd   : > { %p245_p10 = scmp.lt.s32.totalorder (!%p216_p9), %s1445_s25, 1  ;;  %s242_s11 = sand.u32 (!%p216_p9), 1, %s1375_s22  }
   0xe   : > { %219 = sbr.rel (%p216_p9) target bundleno = 1278 (0x4fe), region = 44  ;;  %s1116_s12 = sshll.u32 (!%p216_p9), %s242_s11, 7 }
   0xf   : > { %s1774_s13 = scalar_lea.vmem (!%p216_p9), [#allocation2], %s1116_s12  ;;  %s1151_s14 = sshll.u32 (!%p216_p9), %s1445_s25, 11 }
  0x10   : > { %s1050_s15 = sshll.u32 (!%p216_p9), %s1774_s13, 4  ;;  %s1809_s18 = scalar_lea.hbm (!%p216_p9), %s1863_s6, %s1151_s14  ;;  %s1811_s15 = int_to_ptr.vmem [resolvable:$true] %s1050_s15 }
  0x11   : > { %s1323_s19 = scalar_lea.vmem (!%p216_p9), %s1811_s15, 2048  ;;  %s1386_s20 = smov (!%p216_p9), [#allocation2]  }
  0x12   : > { %p1324_p11 = scmp.ne.s32.totalorder (!%p216_p9), %s1811_s15, %s1323_s19  ;;  %s1327_s26 = sshll.u32 (!%p216_p9), %s1386_s20, 4  ;;  %s1328_s26 = int_to_ptr.vmem [resolvable:$false] %s1327_s26 }
  0x13   : > { %v1385_v0 = vmov 0   ;;  %s246_s9 = scalar_select %p245_p10, %s1445_s25, 1  ;;  %v266_v1 = vld [vmem:[%s1859_s2 + $0x28] sm:$0xff]  ;;  %v268_v2 = vld [vmem:[%s1859_s2 + $0x38] sm:$0xff]  ;;  %v265_v3 = vld [vmem:[%s1859_s2 + $0x20] sm:$0xff]  ;;  %vm339_vm0 = vcmask 130048  }
  0x14   : > { %384 = vmatprep.mubr.bf16.mxu0 %v1385_v0  ;;  %1299 = vset.pattern.permute.xlu1 %v1385_v0  ;;  %v267_v6 = vld [vmem:[%s1859_s2 + $0x30] sm:$0xff]  ;;  %v1303_v7 = vld [vmem:[%s1858_s1] sm:$0xff]   ;;  %v264_v9 = vld [vmem:[%s1859_s2 + $0x18] sm:$0xff]  ;;  %vm457_vm1 = vcmask 523264   ;;  %s1817_s25 = scalar_lea.sflag [#allocation3], %s242_s11  ;;  %p1325_p12 = pnand %p1324_p11, %p1462_p5 }
  0x15   : > { %1298 = vset.pattern.permute.xlu0 %v1385_v0  ;;  %s1150_s10 = sshll.u32 %s246_s9, 4  ;;  %296 = vperm.xlu1 %1299, %v266_v1   ;;  %v263_v8 = vld [vmem:[%s1859_s2 + $0x10] sm:$0xff]  ;;  %v261_v10 = vld [vmem:[%s1859_s2] sm:$0xff]  ;;  %v262_v11 = vld [vmem:[%s1859_s2 + $0x8] sm:$0xff]  ;;  %s1329_s28 = scalar_lea.vmem %s1328_s26, 4096 }
  0x16   : > { %s249_s17 = scalar_lea.vmem %s1857_s0, %s1150_s10  ;;  %306 = vperm.xlu0 %1298, %v268_v2   ;;  %v1304_v12 = vld [vmem:[%s1858_s1 + $0x8] sm:$0xff]   ;;  %v1305_v13 = vld [vmem:[%s1858_s1 + $0x10] sm:$0xff]   ;;  %v1306_v14 = vld [vmem:[%s1858_s1 + $0x18] sm:$0xff]   ;;  %p1326_p13 = pneg %p1325_p12 }
  0x17   : > { %v1300_v4 = vld [vmem:[%s249_s17 + $0x4] ss:$8 sps:$4 sm:$0xff]   ;;  %v1302_v5 = vld [vmem:[%s249_s17] ss:$8 sps:$4 sm:$0xff]   ;;  %p1330_p0 = scmp.lt.s32.totalorder %s1811_s15, %s1328_s26  ;;  %p1331_p1 = scmp.lt.s32.totalorder %s1329_s28, %s1323_s19 }
  0x18   : > { %366 = vmatprep.subr.bf16.mxu0 %v1300_v4  ;;  %v449_v63 = vld [vmem:[%s1862_s5] sm:$0xff] }
  0x19   : > { %367 = vmatpush1.bf16.msra.mxu0 %v1302_v5  ;;  %291 = vperm.xlu1 %1299, %v265_v3   ;;  %p1332_p2 = por %p1331_p1, %p1330_p0 }
  0x1a   : > { %301 = vperm.xlu0 %1298, %v267_v6   ;;  %1200 = vmatprep.mubr.msk.f32.mxu1 %vm457_vm1, %v449_v63 }
  0x1b   : > { %p1333_p3 = pnand %p1332_p2, %p1326_p13 }
  0x1c   : > { %1125 = vmatmul.mubr.msk.bf16.vlgmr.msra.gmra.mxu0 %vm339_vm0, %v1303_v7 }
  0x1d   : > { %394 = vmatprep.mubr.bf16.mxu0 %v1385_v0  ;;  %281 = vperm.xlu1 %1299, %v263_v8   ;;  %v1573_v8 = vld [vmem:[%s1862_s5 + $0x8] sm:$0xff] }
  0x1e   : > { %286 = vperm.xlu0 %1298, %v264_v9   ;;  %v451_v9 = vld [vmem:[%s1862_s5 + $0x10] sm:$0xff] }
  0x21   : > { %271 = vperm.xlu1 %1299, %v261_v10   ;;  %v1584_v10 = vld [vmem:[%s1862_s5 + $0x18] sm:$0xff] }
  0x22   : > { %276 = vperm.xlu0 %1298, %v262_v11   ;;  %v1589_v11 = vld [vmem:[%s1862_s5 + $0x20] sm:$0xff] }
  0x24   : > { %1126 = vmatmul.mubr.msk.bf16.gmra.mxu0 %vm339_vm0, %v1304_v12  ;;  %v1598_v12 = vld [vmem:[%s1862_s5 + $0x28] sm:$0xff] }
  0x25   : > { %404 = vmatprep.mubr.bf16.mxu0 %v1385_v0 }
  0x2c   : > { %1127 = vmatmul.mubr.msk.bf16.gmra.mxu0 %vm339_vm0, %v1305_v13  ;;  %v1603_v13 = vld [vmem:[%s1862_s5 + $0x30] sm:$0xff] }
  0x2d   : > { %414 = vmatprep.mubr.bf16.mxu0 %v1385_v0 }
  0x34   : > { %1128 = vmatmul.mubr.msk.bf16.gmra.mxu0 %vm339_vm0, %v1306_v14  ;;  %v1612_v14 = vld [vmem:[%s1862_s5 + $0x38] sm:$0xff] }
  0x35   : > { %1228 = vmatprep.mubr.msk.f32.mxu0 %vm457_vm1, %v449_v63 }
  0x90   : > { %v297_v30 = vpop.permute.xlu1 %296 }
  0x91   : > { %v307_v22 = vpop.permute.xlu0 %306 }
  0x94   : > { %v292_v42 = vpop.permute.xlu1 %291 }
  0x95   : > { %v302_v26 = vpop.permute.xlu0 %301 }
  0x98   : > { %v282_v53 = vpop.permute.xlu1 %281 }
  0x99   : > { %v287_v31 = vpop.permute.xlu0 %286 }
  0x9c   : > { %v272_v58 = vpop.permute.xlu1 %271 }
  0x9d   : > { %v277_v43 = vpop.permute.xlu0 %276 }
  0xdc   : > { %v386_v15 = vpop.f32.mrf.mxu0 }
  0xdd   : > { %v1561_v61 = vadd.f32 %v386_v15, %v272_v58 }
  0xde   : > { %v388_v16 = vpop.f32.mrf.mxu0 }
  0xdf   : > { %v1557_v59 = vadd.f32 %v388_v16, %v272_v58 }
  0xe0   : > { %v390_v17 = vpop.f32.mrf.mxu0 }
  0xe1   : > { %v1539_v48 = vadd.f32 %v390_v17, %v277_v43  ;;  %v425_v62 = vadd.f32 %v1557_v59, %v1561_v61 }
  0xe2   : > { %v392_v18 = vpop.f32.mrf.mxu0 }
  0xe3   : > { %v1531_v44 = vadd.f32 %v392_v18, %v277_v43 }
  0xe4   : > { %v396_v19 = vpop.f32.mrf.mxu0 }
  0xe5   : > { %v428_v52 = vadd.f32 %v1531_v44, %v1539_v48  ;;  %v1555_v57 = vadd.f32 %v396_v19, %v282_v53 }
  0xe6   : > { %v398_v20 = vpop.f32.mrf.mxu0 }
  0xe7   : > { %v1551_v55 = vadd.f32 %v398_v20, %v282_v53 }
  0xe8   : > { %v400_v21 = vpop.f32.mrf.mxu0 }
  0xe9   : > { %v1525_v39 = vadd.f32 %v400_v21, %v287_v31  ;;  %v431_v60 = vadd.f32 %v1551_v55, %v1555_v57 }
  0xea   : > { %v402_v23 = vpop.f32.mrf.mxu0 }
  0xeb   : > { %v1521_v36 = vadd.f32 %v402_v23, %v287_v31 }
  0xec   : > { %v406_v24 = vpop.f32.mrf.mxu0 }
  0xed   : > { %v434_v47 = vadd.f32 %v1521_v36, %v1525_v39  ;;  %v1549_v54 = vadd.f32 %v406_v24, %v292_v42 }
  0xee   : > { %v408_v25 = vpop.f32.mrf.mxu0 }
  0xef   : > { %v1543_v50 = vadd.f32 %v408_v25, %v292_v42 }
  0xf0   : > { %v410_v27 = vpop.f32.mrf.mxu0 }
  0xf1   : > { %v1541_v49 = vadd.f32 %v410_v27, %v297_v30  ;;  %v437_v56 = vadd.f32 %v1543_v50, %v1549_v54 }
  0xf2   : > { %v412_v28 = vpop.f32.mrf.mxu0 }
  0xf3   : > { %v1533_v45 = vadd.f32 %v412_v28, %v297_v30 }
  0xf4   : > { %v416_v29 = vpop.f32.mrf.mxu0 }
  0xf5   : > { %v1517_v33 = vadd.f32 %v416_v29, %v302_v26  ;;  %v440_v51 = vadd.f32 %v1533_v45, %v1541_v49 }
  0xf6   : > { %v418_v32 = vpop.f32.mrf.mxu0 }
  0xf7   : > { %v1519_v34 = vadd.f32 %v418_v32, %v302_v26 }
  0xf8   : > { %v420_v35 = vpop.f32.mrf.mxu0 }
  0xf9   : > { %v443_v37 = vadd.f32 %v1519_v34, %v1517_v33  ;;  %v1527_v40 = vadd.f32 %v420_v35, %v307_v22 }
  0xfa   : > { %v422_v38 = vpop.f32.mrf.mxu0 }
  0xfb   : > { %v1529_v41 = vadd.f32 %v422_v38, %v307_v22  ;;  %444 = vadd.xlane.f32.xlu1 %v443_v37 }
  0xfd   : > { %v446_v46 = vadd.f32 %v1529_v41, %v1527_v40 }
  0xff   : > { %447 = vadd.xlane.f32.xlu0 %v446_v46  ;;  %435 = vadd.xlane.f32.xlu1 %v434_v47 }
 0x103   : > { %441 = vadd.xlane.f32.xlu0 %v440_v51  ;;  %429 = vadd.xlane.f32.xlu1 %v428_v52 }
 0x107   : > { %438 = vadd.xlane.f32.xlu0 %v437_v56 }
 0x10b   : > { %432 = vadd.xlane.f32.xlu0 %v431_v60 }
 0x10f   : > { %426 = vadd.xlane.f32.xlu0 %v425_v62 }
 0x184   : > { %v445_v1 = vpop.xlane.xlu1 %444 }
 0x188   : > { %v448_v0 = vpop.xlane.xlu0 %447  ;;  %v436_v3 = vpop.xlane.xlu1 %435 }
 0x189   : > { %1184 = vmatprep.subr.mxu1 %v448_v0 }
 0x18a   : > { %1185 = vmatpush3.msra.mxu1 %v448_v0 }
 0x18b   : > { %1186 = vmatprep.subr.mxu1 %v445_v1 }
 0x18c   : > { %1187 = vmatpush3.msra.mxu1 %v445_v1  ;;  %v442_v2 = vpop.xlane.xlu0 %441  ;;  %v430_v6 = vpop.xlane.xlu1 %429 }
 0x18d   : > { %1188 = vmatprep.subr.mxu1 %v442_v2 }
 0x18e   : > { %1189 = vmatpush3.msra.mxu1 %v442_v2 }
 0x190   : > { %v439_v4 = vpop.xlane.xlu0 %438 }
 0x191   : > { %1190 = vmatprep.subr.mxu1 %v439_v4 }
 0x192   : > { %1191 = vmatpush3.msra.mxu1 %v439_v4 }
 0x193   : > { %1192 = vmatprep.subr.mxu1 %v436_v3 }
 0x194   : > { %1193 = vmatpush3.msra.mxu1 %v436_v3  ;;  %v433_v5 = vpop.xlane.xlu0 %432 }
 0x195   : > { %1194 = vmatprep.subr.mxu1 %v433_v5 }
 0x196   : > { %1195 = vmatpush3.msra.mxu1 %v433_v5 }
 0x197   : > { %1196 = vmatprep.subr.mxu1 %v430_v6 }
 0x198   : > { %1197 = vmatpush3.msra.mxu1 %v430_v6  ;;  %v427_v7 = vpop.xlane.xlu0 %426 }
 0x199   : > { %1198 = vmatprep.subr.mxu1 %v427_v7 }
 0x19a   : > { %1199 = vmatpush3.msra.mxu1 %v427_v7 }
 0x19b   : > { %1201 = vmatmul.mubr.msk.f32.vlgmr.msra.gmra.mxu1 %vm457_vm1, %v1573_v8 }
 0x19c   : > { %1203 = vmatprep.mubr.msk.f32.mxu1 %vm457_vm1, %v451_v9 }
 0x19f   : > { %1204 = vmatmul.mubr.msk.f32.gmra.mxu1 %vm457_vm1, %v1584_v10 }
 0x1a0   : > { %1206 = vmatprep.mubr.msk.f32.mxu1 %vm457_vm1, %v1589_v11 }
 0x1a3   : > { %1207 = vmatmul.mubr.msk.f32.gmra.mxu1 %vm457_vm1, %v1598_v12 }
 0x1a4   : > { %1209 = vmatprep.mubr.msk.f32.mxu1 %vm457_vm1, %v1603_v13 }
 0x1a7   : > { %1210 = vmatmul.mubr.msk.f32.gmra.mxu1 %vm457_vm1, %v1612_v14 }
 0x1a8   : > { %1231 = vmatprep.mubr.msk.f32.mxu1 %vm457_vm1, %v451_v9 }
 0x25b   : > { %v1202_v15 = vpop.f32.mrf.mxu1 }
 0x25c   : > { %v588_v28 = vmul.f32 0.00048828125, %v1202_v15 }
 0x25d   : > { %v548_v16 = vpop.f32.mrf.mxu1 }
 0x25e   : > { %v587_v30 = vmul.f32 0.00048828125, %v548_v16 }
 0x25f   : > { %v1205_v17 = vpop.f32.mrf.mxu1 }
 0x260   : > { %v590_v26 = vmul.f32 0.00048828125, %v1205_v17 }
 0x261   : > { %v558_v18 = vpop.f32.mrf.mxu1 }
 0x262   : > { %v589_v29 = vmul.f32 0.00048828125, %v558_v18 }
 0x263   : > { %v1208_v19 = vpop.f32.mrf.mxu1 }
 0x264   : > { %v592_v25 = vmul.f32 0.00048828125, %v1208_v19 }
 0x265   : > { %v568_v20 = vpop.f32.mrf.mxu1 }
 0x266   : > { %v591_v27 = vmul.f32 0.00048828125, %v568_v20 }
 0x267   : > { %v1211_v21 = vpop.f32.mrf.mxu1 }
 0x268   : > { %v594_v22 = vmul.f32 0.00048828125, %v1211_v21 }
 0x269   : > { %v578_v23 = vpop.f32.mrf.mxu1 }
 0x26a   : > { %v593_v24 = vmul.f32 0.00048828125, %v578_v23  ;;  %632 = vperm.xlu1 %1299, %v594_v22   ;;  %v877_v23 = vld [vmem:[%s1860_s3 + $0x8] sm:$0xff] }
 0x26c   : > { %627 = vperm.xlu0 %1298, %v593_v24   ;;  %v876_v24 = vld [vmem:[%s1860_s3] sm:$0xff] }
 0x26e   : > { %622 = vperm.xlu1 %1299, %v592_v25   ;;  %v883_v25 = vld [vmem:[%s1860_s3 + $0x38] sm:$0xff] }
 0x270   : > { %612 = vperm.xlu0 %1298, %v590_v26   ;;  %v878_v26 = vld [vmem:[%s1860_s3 + $0x10] sm:$0xff] }
 0x272   : > { %617 = vperm.xlu1 %1299, %v591_v27   ;;  %v941_v27 = vld [vmem:[%s1861_s4 + $0x8] sm:$0xff] }
 0x274   : > { %602 = vperm.xlu0 %1298, %v588_v28   ;;  %v880_v28 = vld [vmem:[%s1860_s3 + $0x20] sm:$0xff] }
 0x276   : > { %607 = vperm.xlu1 %1299, %v589_v29   ;;  %v943_v29 = vld [vmem:[%s1861_s4 + $0x18] sm:$0xff] }
 0x27a   : > { %597 = vperm.xlu1 %1299, %v587_v30   ;;  %v882_v30 = vld [vmem:[%s1860_s3 + $0x30] sm:$0xff] }
 0x2e5   : > { %v633_v31 = vpop.permute.xlu1 %632 }
 0x2e6   : > { %v1618_v32 = vsub.f32 %v1527_v40, %v633_v31  ;;  %v1621_v35 = vsub.f32 %v1529_v41, %v633_v31  ;;  %v945_v31 = vld [vmem:[%s1861_s4 + $0x28] sm:$0xff] }
 0x2e7   : > { %v628_v37 = vpop.permute.xlu0 %627 }
 0x2e8   : > { %v1624_v38 = vsub.f32 %v1517_v33, %v628_v37  ;;  %v1627_v42 = vsub.f32 %v1519_v34, %v628_v37  ;;  %v665_v43 = vmul.f32 %v1618_v32, %v1618_v32  ;;  %v666_v46 = vmul.f32 %v1621_v35, %v1621_v35  ;;  %v940_v37 = vld [vmem:[%s1861_s4] sm:$0xff] }
 0x2e9   : > { %v623_v47 = vpop.permute.xlu1 %622 }
 0x2ea   : > { %v1634_v40 = vsub.f32 %v1541_v49, %v623_v47  ;;  %v1637_v41 = vsub.f32 %v1533_v45, %v623_v47  ;;  %v688_v51 = vadd.f32 %v666_v46, %v665_v43  ;;  %v663_v33 = vmul.f32 %v1624_v38, %v1624_v38  ;;  %v942_v43 = vld [vmem:[%s1861_s4 + $0x10] sm:$0xff]  ;;  %v944_v46 = vld [vmem:[%s1861_s4 + $0x20] sm:$0xff] }
 0x2eb   : > { %v613_v52 = vpop.permute.xlu0 %612  ;;  %v664_v34 = vmul.f32 %v1627_v42, %v1627_v42 }
 0x2ec   : > { %v1644_v53 = vsub.f32 %v1525_v39, %v613_v52  ;;  %v1647_v56 = vsub.f32 %v1521_v36, %v613_v52  ;;  %689 = vadd.xlane.f32.xlu0 %v688_v51  ;;  %v661_v49 = vmul.f32 %v1634_v40, %v1634_v40  ;;  %v662_v45 = vmul.f32 %v1637_v41, %v1637_v41 }
 0x2ed   : > { %v618_v58 = vpop.permute.xlu1 %617  ;;  %v685_v60 = vadd.f32 %v664_v34, %v663_v33 }
 0x2ee   : > { %v1654_v62 = vsub.f32 %v1549_v54, %v618_v58  ;;  %v1657_v63 = vsub.f32 %v1543_v50, %v618_v58  ;;  %v682_v39 = vadd.f32 %v662_v45, %v661_v49  ;;  %v657_v36 = vmul.f32 %v1644_v53, %v1644_v53 }
 0x2ef   : > { %686 = vadd.xlane.f32.xlu1 %v685_v60  ;;  %v603_v0 = vpop.permute.xlu0 %602  ;;  %v658_v1 = vmul.f32 %v1647_v56, %v1647_v56 }
 0x2f0   : > { %v1664_v2 = vsub.f32 %v1539_v48, %v603_v0  ;;  %v1667_v3 = vsub.f32 %v1531_v44, %v603_v0  ;;  %683 = vadd.xlane.f32.xlu0 %v682_v39  ;;  %v659_v50 = vmul.f32 %v1654_v62, %v1654_v62  ;;  %v660_v54 = vmul.f32 %v1657_v63, %v1657_v63 }
 0x2f1   : > { %v608_v4 = vpop.permute.xlu1 %607  ;;  %v676_v5 = vadd.f32 %v658_v1, %v657_v36 }
 0x2f2   : > { %v1674_v6 = vsub.f32 %v1555_v57, %v608_v4  ;;  %v1677_v7 = vsub.f32 %v1551_v55, %v608_v4  ;;  %v679_v48 = vadd.f32 %v660_v54, %v659_v50  ;;  %v653_v44 = vmul.f32 %v1664_v2, %v1664_v2 }
 0x2f3   : > { %677 = vadd.xlane.f32.xlu1 %v676_v5  ;;  %v654_v9 = vmul.f32 %v1667_v3, %v1667_v3 }
 0x2f4   : > { %680 = vadd.xlane.f32.xlu0 %v679_v48  ;;  %v655_v15 = vmul.f32 %v1674_v6, %v1674_v6  ;;  %v656_v16 = vmul.f32 %v1677_v7, %v1677_v7 }
 0x2f5   : > { %v598_v57 = vpop.permute.xlu1 %597  ;;  %v670_v17 = vadd.f32 %v654_v9, %v653_v44 }
 0x2f6   : > { %v1688_v55 = vsub.f32 %v1561_v61, %v598_v57  ;;  %v1691_v18 = vsub.f32 %v1557_v59, %v598_v57  ;;  %v673_v19 = vadd.f32 %v656_v16, %v655_v15  ;;  %v879_v59 = vld [vmem:[%s1860_s3 + $0x18] sm:$0xff]  ;;  %v881_v61 = vld [vmem:[%s1860_s3 + $0x28] sm:$0xff] }
 0x2f7   : > { %671 = vadd.xlane.f32.xlu1 %v670_v17 }
 0x2f8   : > { %674 = vadd.xlane.f32.xlu0 %v673_v19  ;;  %v651_v20 = vmul.f32 %v1688_v55, %v1688_v55  ;;  %v652_v21 = vmul.f32 %v1691_v18, %v1691_v18 }
 0x2fa   : > { %v667_v22 = vadd.f32 %v652_v21, %v651_v20 }
 0x2fc   : > { %668 = vadd.xlane.f32.xlu0 %v667_v22 }
 0x308   : > { %891 = vperm.xlu1 %1299, %v877_v23  }
 0x30c   : > { %901 = vperm.xlu1 %1299, %v879_v59  }
 0x310   : > { %911 = vperm.xlu1 %1299, %v881_v61  }
 0x312   : > { %886 = vperm.xlu0 %1298, %v876_v24  }
 0x314   : > { %921 = vperm.xlu1 %1299, %v883_v25   ;;  %v946_v25 = vld [vmem:[%s1861_s4 + $0x30] sm:$0xff] }
 0x316   : > { %896 = vperm.xlu0 %1298, %v878_v26  }
 0x318   : > { %955 = vperm.xlu1 %1299, %v941_v27  }
 0x31a   : > { %906 = vperm.xlu0 %1298, %v880_v28   ;;  %v947_v28 = vld [vmem:[%s1861_s4 + $0x38] sm:$0xff] }
 0x31c   : > { %965 = vperm.xlu1 %1299, %v943_v29  }
 0x31e   : > { %916 = vperm.xlu0 %1298, %v882_v30  }
 0x320   : > { %975 = vperm.xlu1 %1299, %v945_v31  }
 0x322   : > { %950 = vperm.xlu0 %1298, %v940_v37  }
 0x326   : > { %960 = vperm.xlu0 %1298, %v942_v43  }
 0x32a   : > { %970 = vperm.xlu0 %1298, %v944_v46  }
 0x375   : > { %v690_v47 = vpop.xlane.xlu0 %689 }
 0x376   : > { %1212 = vmatprep.subr.mxu0 %v690_v47  ;;  %1240 = vmatprep.subr.mxu1 %v690_v47 }
 0x377   : > { %1213 = vmatpush3.msra.mxu0 %v690_v47  ;;  %1248 = vmatpush3.msra.mxu1 %v690_v47 }
 0x378   : > { %v687_v51 = vpop.xlane.xlu1 %686 }
 0x379   : > { %1214 = vmatprep.subr.mxu0 %v687_v51  ;;  %1241 = vmatprep.subr.mxu1 %v687_v51  ;;  %v684_v33 = vpop.xlane.xlu0 %683 }
 0x37a   : > { %1215 = vmatpush3.msra.mxu0 %v687_v51  ;;  %1249 = vmatpush3.msra.mxu1 %v687_v51 }
 0x37b   : > { %1216 = vmatprep.subr.mxu0 %v684_v33  ;;  %1242 = vmatprep.subr.mxu1 %v684_v33 }
 0x37c   : > { %1217 = vmatpush3.msra.mxu0 %v684_v33  ;;  %1250 = vmatpush3.msra.mxu1 %v684_v33  ;;  %v678_v52 = vpop.xlane.xlu1 %677 }
 0x37d   : > { %v681_v34 = vpop.xlane.xlu0 %680 }
 0x37e   : > { %1218 = vmatprep.subr.mxu0 %v681_v34  ;;  %1243 = vmatprep.subr.mxu1 %v681_v34 }
 0x37f   : > { %1219 = vmatpush3.msra.mxu0 %v681_v34  ;;  %1251 = vmatpush3.msra.mxu1 %v681_v34 }
 0x380   : > { %1220 = vmatprep.subr.mxu0 %v678_v52  ;;  %1244 = vmatprep.subr.mxu1 %v678_v52  ;;  %v672_v45 = vpop.xlane.xlu1 %671 }
 0x381   : > { %1221 = vmatpush3.msra.mxu0 %v678_v52  ;;  %1252 = vmatpush3.msra.mxu1 %v678_v52  ;;  %v675_v49 = vpop.xlane.xlu0 %674 }
 0x382   : > { %1222 = vmatprep.subr.mxu0 %v675_v49  ;;  %1245 = vmatprep.subr.mxu1 %v675_v49 }
 0x383   : > { %1223 = vmatpush3.msra.mxu0 %v675_v49  ;;  %1253 = vmatpush3.msra.mxu1 %v675_v49 }
 0x384   : > { %1224 = vmatprep.subr.mxu0 %v672_v45  ;;  %1246 = vmatprep.subr.mxu1 %v672_v45  ;;  %v892_v30 = vpop.permute.xlu1 %891 }
 0x385   : > { %1225 = vmatpush3.msra.mxu0 %v672_v45  ;;  %1254 = vmatpush3.msra.mxu1 %v672_v45  ;;  %v669_v58 = vpop.xlane.xlu0 %668 }
 0x386   : > { %1226 = vmatprep.subr.mxu0 %v669_v58  ;;  %1247 = vmatprep.subr.mxu1 %v669_v58 }
 0x387   : > { %1227 = vmatpush3.msra.mxu0 %v669_v58  ;;  %1255 = vmatpush3.msra.mxu1 %v669_v58 }
 0x388   : > { %1229 = vmatmul.mubr.msk.f32.vlgmr.msra.gmra.mxu0 %vm457_vm1, %v1573_v8  ;;  %1232 = vmatmul.mubr.msk.f32.vlgmr.msra.gmra.mxu1 %vm457_vm1, %v1584_v10  ;;  %v902_v37 = vpop.permute.xlu1 %901 }
 0x389   : > { %1234 = vmatprep.mubr.msk.f32.mxu1 %vm457_vm1, %v1589_v11 }
 0x38c   : > { %1235 = vmatmul.mubr.msk.f32.gmra.mxu1 %vm457_vm1, %v1598_v12  ;;  %v1757_v46 = vpop.permute.xlu1 %911 }
 0x38d   : > { %1237 = vmatprep.mubr.msk.f32.mxu1 %vm457_vm1, %v1603_v13  ;;  %v887_v29 = vpop.permute.xlu0 %886 }
 0x390   : > { %1238 = vmatmul.mubr.msk.f32.gmra.mxu1 %vm457_vm1, %v1612_v14  ;;  %v1759_v51 = vpop.permute.xlu1 %921 }
 0x391   : > { %v897_v31 = vpop.permute.xlu0 %896 }
 0x394   : > { %v956_v52 = vpop.permute.xlu1 %955 }
 0x395   : > { %v907_v43 = vpop.permute.xlu0 %906 }
 0x398   : > { %v966_v49 = vpop.permute.xlu1 %965 }
 0x399   : > { %v917_v47 = vpop.permute.xlu0 %916 }
 0x39c   : > { %v1761_v58 = vpop.permute.xlu1 %975 }
 0x39d   : > { %v951_v33 = vpop.permute.xlu0 %950 }
 0x3a1   : > { %v961_v34 = vpop.permute.xlu0 %960 }
 0x3a5   : > { %v971_v45 = vpop.permute.xlu0 %970 }
 0x448   : > { %v1230_v60 = vpop.f32.mrf.mxu0  ;;  %v1233_v39 = vpop.f32.mrf.mxu1 }
 0x449   : > { %v797_v36 = vmul.f32 0.00048828125, %v1230_v60  ;;  %v799_v0 = vmul.f32 0.00048828125, %v1233_v39 }
 0x44a   : > { %v767_v8 = vpop.f32.mrf.mxu1  ;;  %v757_v1 = vpop.f32.mrf.mxu0 }
 0x44b   : > { %v805_v50 = vadd.f32 1e-05, %v797_v36  ;;  %v807_v10 = vadd.f32 1e-05, %v799_v0  ;;  %v796_v54 = vmul.f32 0.00048828125, %v757_v1  ;;  %v798_v11 = vmul.f32 0.00048828125, %v767_v8 }
 0x44c   : > { %v1236_v4 = vpop.f32.mrf.mxu1 }
 0x44d   : > { %1307 = vrsqrt.f32 %v805_v50  ;;  %v804_v12 = vadd.f32 1e-05, %v796_v54  ;;  %v806_v9 = vadd.f32 1e-05, %v798_v11  ;;  %v801_v14 = vmul.f32 0.00048828125, %v1236_v4 }
 0x44e   : > { %1309 = vrsqrt.f32 %v807_v10  ;;  %v777_v5 = vpop.f32.mrf.mxu1 }
 0x44f   : > { %v800_v48 = vmul.f32 0.00048828125, %v777_v5  ;;  %1311 = vrsqrt.f32 %v804_v12  ;;  %v809_v17 = vadd.f32 1e-05, %v801_v14 }
 0x450   : > { %v1239_v13 = vpop.f32.mrf.mxu1 }
 0x451   : > { %v808_v44 = vadd.f32 1e-05, %v800_v48  ;;  %v803_v19 = vmul.f32 0.00048828125, %v1239_v13 }
 0x452   : > { %v787_v15 = vpop.f32.mrf.mxu1 }
 0x453   : > { %1313 = vrsqrt.f32 %v808_v44  ;;  %v802_v16 = vmul.f32 0.00048828125, %v787_v15  ;;  %v811_v21 = vadd.f32 1e-05, %v803_v19 }
 0x454   : > { %1315 = vrsqrt.f32 %v806_v9 }
 0x455   : > { %v810_v57 = vadd.f32 1e-05, %v802_v16 }
 0x457   : > { %1317 = vrsqrt.f32 %v810_v57 }
 0x458   : > { %1319 = vrsqrt.f32 %v809_v17 }
 0x459   : > { %1321 = vrsqrt.f32 %v811_v21 }
 0x45a   : > { %v1308_v20 = vpop.eup %1307 }
 0x45b   : > { %v1310_v22 = vpop.eup %1309  ;;  %827 = vperm.xlu0 %1298, %v1308_v20  }
 0x45c   : > { %837 = vperm.xlu1 %1299, %v1310_v22   ;;  %v1312_v23 = vpop.eup %1311 }
 0x460   : > { %v1314_v59 = vpop.eup %1313  ;;  %822 = vperm.xlu1 %1299, %v1312_v23  }
 0x461   : > { %842 = vperm.xlu0 %1298, %v1314_v59   ;;  %v1316_v61 = vpop.eup %1315 }
 0x464   : > { %v1318_v24 = vpop.eup %1317  ;;  %832 = vperm.xlu1 %1299, %v1316_v61  }
 0x465   : > { %852 = vperm.xlu0 %1298, %v1318_v24   ;;  %v1320_v26 = vpop.eup %1319 }
 0x466   : > { %v1322_v27 = vpop.eup %1321 }
 0x468   : > { %847 = vperm.xlu1 %1299, %v1320_v26  }
 0x469   : > { %980 = vperm.xlu0 %1298, %v946_v25  }
 0x46c   : > { %857 = vperm.xlu1 %1299, %v1322_v27  }
 0x470   : > { %985 = vperm.xlu1 %1299, %v947_v28  }
 0x4d6   : > { %v828_v60 = vpop.permute.xlu0 %827 }
 0x4d7   : > { %v838_v39 = vpop.permute.xlu1 %837  ;;  %v862_v36 = vmul.f32 %v828_v60, %v1664_v2  ;;  %v863_v0 = vmul.f32 %v828_v60, %v1667_v3 }
 0x4d8   : > { %v866_v8 = vmul.f32 %v838_v39, %v1644_v53  ;;  %v867_v1 = vmul.f32 %v838_v39, %v1647_v56 }
 0x4d9   : > { %v926_v50 = vmul.f32 %v892_v30, %v862_v36  ;;  %v927_v10 = vmul.f32 %v892_v30, %v863_v0 }
 0x4da   : > { %v930_v54 = vmul.f32 %v902_v37, %v866_v8  ;;  %v931_v4 = vmul.f32 %v902_v37, %v867_v1 }
 0x4db   : > { %v990_v11 = vadd.f32 %v956_v52, %v926_v50  ;;  %v991_v12 = vadd.f32 %v956_v52, %v927_v10  ;;  %v823_v5 = vpop.permute.xlu1 %822 }
 0x4dc   : > { %v994_v48 = vadd.f32 %v966_v49, %v930_v54  ;;  %v995_v13 = vadd.f32 %v966_v49, %v931_v4  ;;  %v860_v44 = vmul.f32 %v823_v5, %v1688_v55  ;;  %v861_v2 = vmul.f32 %v823_v5, %v1691_v18  ;;  %v843_v3 = vpop.permute.xlu0 %842 }
 0x4dd   : > { %v1006_v9 = vmax.f32 %v990_v11, 0.0  ;;  %v1007_v53 = vmax.f32 %v991_v12, 0.0  ;;  %v868_v56 = vmul.f32 %v843_v3, %v1654_v62  ;;  %v869_v14 = vmul.f32 %v843_v3, %v1657_v63 }
 0x4de   : > { %v1010_v15 = vmax.f32 %v994_v48, 0.0  ;;  %v1011_v16 = vmax.f32 %v995_v13, 0.0  ;;  %v924_v57 = vmul.f32 %v887_v29, %v860_v44  ;;  %v925_v17 = vmul.f32 %v887_v29, %v861_v2 }
 0x4df   : > { %1022 = vst [vmem:[%s1774_s13 + $0x10] sm:$0xff] %v1006_v9  ;;  %1023 = vst [vmem:[%s1774_s13 + $0x18] sm:$0xff] %v1007_v53  ;;  %v932_v55 = vmul.f32 %v907_v43, %v868_v56  ;;  %v933_v18 = vmul.f32 %v907_v43, %v869_v14  ;;  %v833_v19 = vpop.permute.xlu1 %832 }
 0x4e0   : > { %1026 = vst [vmem:[%s1774_s13 + $0x30] sm:$0xff] %v1010_v15  ;;  %1027 = vst [vmem:[%s1774_s13 + $0x38] sm:$0xff] %v1011_v16  ;;  %v988_v62 = vadd.f32 %v951_v33, %v924_v57  ;;  %v989_v20 = vadd.f32 %v951_v33, %v925_v17  ;;  %v864_v63 = vmul.f32 %v833_v19, %v1674_v6  ;;  %v853_v22 = vpop.permute.xlu0 %852 }
 0x4e1   : > { %v865_v21 = vmul.f32 %v833_v19, %v1677_v7  ;;  %v996_v23 = vadd.f32 %v971_v45, %v932_v55  ;;  %v997_v59 = vadd.f32 %v971_v45, %v933_v18  ;;  %v872_v61 = vmul.f32 %v853_v22, %v1624_v38 }
 0x4e2   : > { %v873_v24 = vmul.f32 %v853_v22, %v1627_v42  ;;  %v1004_v25 = vmax.f32 %v988_v62, 0.0  ;;  %v1005_v26 = vmax.f32 %v989_v20, 0.0  ;;  %v928_v27 = vmul.f32 %v897_v31, %v864_v63 }
 0x4e3   : > { %v929_v28 = vmul.f32 %v897_v31, %v865_v21  ;;  %v1012_v29 = vmax.f32 %v996_v23, 0.0  ;;  %v1013_v30 = vmax.f32 %v997_v59, 0.0  ;;  %v848_v6 = vpop.permute.xlu1 %847  ;;  %v936_v37 = vmul.f32 %v917_v47, %v872_v61 }
 0x4e4   : > { %v937_v43 = vmul.f32 %v917_v47, %v873_v24  ;;  %1020 = vst [vmem:[%s1774_s13] sm:$0xff] %v1004_v25  ;;  %1021 = vst [vmem:[%s1774_s13 + $0x8] sm:$0xff] %v1005_v26  ;;  %v992_v7 = vadd.f32 %v961_v34, %v928_v27  ;;  %v870_v38 = vmul.f32 %v848_v6, %v1634_v40  ;;  %v981_v52 = vpop.permute.xlu0 %980 }
 0x4e5   : > { %v993_v33 = vadd.f32 %v961_v34, %v929_v28  ;;  %v871_v42 = vmul.f32 %v848_v6, %v1637_v41  ;;  %1028 = vst [vmem:[%s1774_s13 + $0x40] sm:$0xff] %v1012_v29  ;;  %1029 = vst [vmem:[%s1774_s13 + $0x48] sm:$0xff] %v1013_v30  ;;  %v1000_v31 = vadd.f32 %v981_v52, %v936_v37 }
 0x4e6   : > { %v1001_v49 = vadd.f32 %v981_v52, %v937_v43  ;;  %v1008_v45 = vmax.f32 %v992_v7, 0.0  ;;  %v934_v47 = vmul.f32 %v1757_v46, %v870_v38 }
 0x4e7   : > { %v1009_v60 = vmax.f32 %v993_v33, 0.0  ;;  %v935_v39 = vmul.f32 %v1757_v46, %v871_v42  ;;  %v1016_v34 = vmax.f32 %v1000_v31, 0.0  ;;  %v858_v40 = vpop.permute.xlu1 %857 }
 0x4e8   : > { %v1017_v36 = vmax.f32 %v1001_v49, 0.0  ;;  %1024 = vst [vmem:[%s1774_s13 + $0x20] sm:$0xff] %v1008_v45  ;;  %v998_v41 = vadd.f32 %v1761_v58, %v934_v47  ;;  %v874_v8 = vmul.f32 %v858_v40, %v1618_v32  ;;  %v875_v1 = vmul.f32 %v858_v40, %v1621_v35 }
 0x4e9   : > { %1025 = vst [vmem:[%s1774_s13 + $0x28] sm:$0xff] %v1009_v60  ;;  %v999_v0 = vadd.f32 %v1761_v58, %v935_v39  ;;  %1032 = vst [vmem:[%s1774_s13 + $0x60] sm:$0xff] %v1016_v34 }
 0x4ea   : > { %1033 = vst [vmem:[%s1774_s13 + $0x68] sm:$0xff] %v1017_v36  ;;  %v1014_v46 = vmax.f32 %v998_v41, 0.0  ;;  %v938_v10 = vmul.f32 %v1759_v51, %v874_v8  ;;  %v939_v54 = vmul.f32 %v1759_v51, %v875_v1 }
 0x4eb   : > { %v1015_v50 = vmax.f32 %v999_v0, 0.0  ;;  %v986_v4 = vpop.permute.xlu1 %985 }
 0x4ec   : > { %1030 = vst [vmem:[%s1774_s13 + $0x50] sm:$0xff] %v1014_v46  ;;  %v1002_v32 = vadd.f32 %v986_v4, %v938_v10  ;;  %v1003_v58 = vadd.f32 %v986_v4, %v939_v54 }
 0x4ed   : > { %1031 = vst [vmem:[%s1774_s13 + $0x58] sm:$0xff] %v1015_v50 }
 0x4ee   : > { %v1018_v35 = vmax.f32 %v1002_v32, 0.0  ;;  %v1019_v51 = vmax.f32 %v1003_v58, 0.0 }
 0x4f0   : > { %1034 = vst [vmem:[%s1774_s13 + $0x70] sm:$0xff] %v1018_v35  ;;  %1035 = vst [vmem:[%s1774_s13 + $0x78] sm:$0xff] %v1019_v51 }
 0x4f1   : > { %1336 = shalt.err (!%p1333_p3)
}
 0x4f2   : > { %s1337_s29 = scalar_lea.hbm %s1809_s18, 2048  ;;  %s1341_s11 = scalar_lea.hbm %s1863_s6, 4096 }
 0x4f3   : > { %p1338_p4 = scmp.ne.s32.totalorder %s1809_s18, %s1337_s29  ;;  %p1342_p9 = scmp.lt.s32.totalorder %s1809_s18, %s1863_s6 }
 0x4f4   : > { %p1343_p10 = scmp.lt.s32.totalorder %s1341_s11, %s1337_s29 }
 0x4f5   : > { %p1339_p7 = pnand %p1338_p4, %p1462_p5 }
 0x4f6   : > { %p1344_p11 = por %p1343_p10, %p1342_p9 }
 0x4f7   : > { %p1340_p8 = pneg %p1339_p7 }
 0x4f9   : > { %p1345_p12 = pnand %p1344_p11, %p1340_p8 }
 0x4fb   : > { %1348 = shalt.err (!%p1345_p12)
}
 0x4fc   : > { %s1387_s14 = smov 256   ;;  %s1388_s16 = smov 16  }
 0x4fd   : > { %1256 = dma.vmem_to_hbm [thread:$0]  (%p1462_p5), %s1811_s15, 2048, %s1809_s18, %s1817_s25, %s1387_s14, %s1387_s14, %s1388_s16  }
 0x4fe PF: > { %p1262_p13 = scmp.ge.s32.totalorder %s1383_s24, 2  ;;  %s1065_s17 = sand.u32 1, %s1371_s21  }
 0x4ff   : > { %s1066_s19 = scalar_lea.sflag [#allocation3], %s1065_s17 }
 0x500   : > { %p1259_p0 = pnand %p1262_p13, %p1466_p6 }
 0x502   : > { %p1260_p1 = pneg %p1259_p0 }
 0x504   : > { %1366 = dma.done.wait (%p1260_p1), %s1066_s19, 2048  }
 0x505   : > { %1368 = vsyncadd (%p1260_p1), %s1066_s19, 4294965248  ;;  %p16_p2 = scmp.ge.s32.totalorder %s1449_s27, 4   ;;  %s1866_s21 = smov %s1375_s22 }
 0x506   : > { %s1867_s22 = smov %s1379_s23  ;;  %s1868_s23 = smov %s1460_s30 }
 0x507   : > { %s1869_s24 = smov %s1449_s27  ;;  %18 = sbr.rel (!%p16_p2) target bundleno = 3 (0x3), region = 79 }
 0x50c   :  { %1071 = vsyncpa [#allocation3], 1 }
 0x50d   :  { %1073 = vsyncpa [#allocation3 + $0x1], 1 }

</bundles_post_ra>
